<compile_context>
chip_gen: v5e
topology: v5e:2x2
jax: 0.10.0
libtpu: 0.0.40
codegen_flags: <defaults>
</compile_context>

<pallas_src>
import functools
import math

import jax
import jax.numpy as jnp
from jax import lax
from jax.experimental import pallas as pl
from jax.experimental.pallas import tpu as pltpu


# ---------------------------------------------------------------------------
# Kernel 1: QKV projection.  q/k/v come out already in the exact (B, T, C)
# bf16 layout kernel 2 consumes (heads along lanes) -> no inter-kernel
# activation re-copy through HBM.
# ---------------------------------------------------------------------------
def _qkv_proj_kernel(x_ref, wq_ref, wk_ref, wv_ref, bq_ref, bk_ref, bv_ref,
                     q_ref, k_ref, v_ref):
    x = x_ref[0].astype(jnp.bfloat16)                       # (tm, C)
    q = jnp.dot(x, wq_ref[...], preferred_element_type=jnp.float32) + bq_ref[...]
    k = jnp.dot(x, wk_ref[...], preferred_element_type=jnp.float32) + bk_ref[...]
    v = jnp.dot(x, wv_ref[...], preferred_element_type=jnp.float32) + bv_ref[...]
    q_ref[0] = q.astype(q_ref.dtype)
    k_ref[0] = k.astype(k_ref.dtype)
    v_ref[0] = v.astype(v_ref.dtype)


# ---------------------------------------------------------------------------
# Kernel 2: flash attention (online softmax over KV tiles) for ALL heads of a
# query tile per grid step, fused with the output projection at finalize.
# grid = (B, num_q_tiles, num_kv_tiles)
# ---------------------------------------------------------------------------
def _flash_attn_proj_kernel(q_ref, k_ref, v_ref, wp_ref, bp_ref, o_ref,
                            m_sc, l_sc, acc_sc, *, scale, n_head, hd, tq, tk):
    qi = pl.program_id(1)
    kv = pl.program_id(2)
    n_kv = pl.num_programs(2)

    q0 = qi * tq
    k0 = kv * tk

    # Reset online-softmax state at the start of each query tile's KV sweep.
    @pl.when(kv == 0)
    def _():
        m_sc[...] = jnp.full(m_sc.shape, -jnp.inf, m_sc.dtype)
        l_sc[...] = jnp.zeros(l_sc.shape, l_sc.dtype)
        acc_sc[...] = jnp.zeros(acc_sc.shape, acc_sc.dtype)

    def process(apply_mask):
        q = q_ref[0]                                        # (tq, C) bf16
        k = k_ref[0]                                        # (tk, C) bf16
        v = v_ref[0]                                        # (tk, C) bf16
        if apply_mask:
            rows = q0 + lax.broadcasted_iota(jnp.int32, (tq, tk), 0)
            cols = k0 + lax.broadcasted_iota(jnp.int32, (tq, tk), 1)
            causal = rows >= cols
        # All heads of this (q-tile, kv-tile) pair are handled in one grid
        # step (heads live along the lane dim of q/k/v).
        for h in range(n_head):
            sl = slice(h * hd, (h + 1) * hd)
            s = lax.dot_general(q[:, sl], k[:, sl], (((1,), (1,)), ((), ())),
                                preferred_element_type=jnp.float32) * scale
            if apply_mask:
                s = jnp.where(causal, s, jnp.float32(-1e10))
            m_prev = m_sc[h]                                # (tq, 1)
            m_new = jnp.maximum(m_prev, s.max(axis=-1, keepdims=True))
            alpha = jnp.exp(m_prev - m_new)
            p = jnp.exp(s - m_new)                          # f32 softmax math
            # TODO(synk): fold p.sum into the MXU (ones column) only if a
            # bundle dump ever shows the XLU as the saturated slot.
            l_sc[h] = alpha * l_sc[h] + p.sum(axis=-1, keepdims=True)
            acc_sc[h] = alpha * acc_sc[h] + jnp.dot(
                p.astype(v.dtype), v[:, sl], preferred_element_type=jnp.float32)
            m_sc[h] = m_new
        # TODO(synk): attn_drop is identity here (eval mode).

    # Interior tiles (entirely below the diagonal): no mask math at all.
    @pl.when(k0 + (tk - 1) <= q0)
    def _():
        process(apply_mask=False)

    # Tiles crossed by the causal diagonal (and not fully above it).
    @pl.when(jnp.logical_and(k0 + (tk - 1) > q0, k0 <= q0 + (tq - 1)))
    def _():
        process(apply_mask=True)

    # Fully-masked tiles (k0 > q0 + tq - 1): no compute; their K/V DMAs are
    # already elided by the clamped index maps in the wrapper.

    # Finalize: normalize each head, concatenate along lanes and run the fused
    # output projection once per (b, q-tile) as a (tq, C) @ (C, C) matmul.
    @pl.when(kv == n_kv - 1)
    def _():
        parts = []
        for h in range(n_head):
            inv_l = pl.reciprocal(l_sc[h], approx=False)    # (tq, 1) exact
            parts.append(acc_sc[h] * inv_l)                 # (tq, hd) f32
        y = jnp.concatenate(parts, axis=-1).astype(jnp.bfloat16)   # (tq, C)
        out = jnp.dot(y, wp_ref[...], preferred_element_type=jnp.float32)
        o_ref[0] = (out + bp_ref[...]).astype(o_ref.dtype)
        # TODO(synk): resid_drop is identity here (eval mode).


def causal_self_attention(x, params, n_head):
    """x: (B, T, C) float32.  params: dict of (C, C) weights and (1, C) biases."""
    B, T, C = x.shape
    assert C % n_head == 0
    hd = C // n_head

    # Host-side dtype plumbing only (no layout changes, done once).
    wq = params["wq"].astype(jnp.bfloat16)
    wk = params["wk"].astype(jnp.bfloat16)
    wv = params["wv"].astype(jnp.bfloat16)
    wp = params["wp"].astype(jnp.bfloat16)
    bq, bk, bv, bp = params["bq"], params["bk"], params["bv"], params["bp"]

    # ---- kernel 1: QKV projection ------------------------------------------
    tm = min(T, 256)                       # 256 rows fills the v6e/v7x MXU
    assert T % tm == 0
    w_spec = pl.BlockSpec((C, C), lambda b, t: (0, 0),
                          pipeline_mode=pl.Buffered(1))     # invariant weight
    b_spec = pl.BlockSpec((1, C), lambda b, t: (0, 0))
    o_spec = pl.BlockSpec((1, tm, C), lambda b, t: (b, t, 0))
    q, k, v = pl.pallas_call(
        _qkv_proj_kernel,
        out_shape=(jax.ShapeDtypeStruct((B, T, C), jnp.bfloat16),) * 3,
        grid_spec=pltpu.PrefetchScalarGridSpec(
            num_scalar_prefetch=0,
            grid=(B, T // tm),
            in_specs=[
                pl.BlockSpec((1, tm, C), lambda b, t: (b, t, 0)),   # x (f32)
                w_spec, w_spec, w_spec,                             # Wq Wk Wv
                b_spec, b_spec, b_spec,                             # bq bk bv
            ],
            out_specs=(o_spec, o_spec, o_spec),
        ),
        compiler_params=pltpu.CompilerParams(
            dimension_semantics=("parallel", "parallel"),
            vmem_limit_bytes=64 * 1024 * 1024),
        cost_estimate=pl.CostEstimate(
            flops=2 * B * T * C * 3 * C,
            transcendentals=0,
            bytes_accessed=B * T * C * 4 + 3 * C * C * 2 + 3 * B * T * C * 2),
    )(x, wq, wk, wv, bq, bk, bv)

    # ---- kernel 2: flash attention + fused output projection ---------------
    tq = min(T, 256)
    tk = min(T, 256)
    assert T % tq == 0 and T % tk == 0
    n_q, n_kv = T // tq, T // tk
    scale = 1.0 / math.sqrt(hd)

    def kv_block(b, qi, kv):
        # Clamp at the causal diagonal: fully-masked KV tiles repeat the
        # previous block index so Pallas elides their HBM DMA entirely.
        kv_cap = ((qi + 1) * tq - 1) // tk
        return (b, jnp.minimum(kv, kv_cap), 0)

    kernel = functools.partial(_flash_attn_proj_kernel, scale=scale,
                               n_head=n_head, hd=hd, tq=tq, tk=tk)

    return pl.pallas_call(
        kernel,
        out_shape=jax.ShapeDtypeStruct((B, T, C), x.dtype),
        grid_spec=pltpu.PrefetchScalarGridSpec(
            num_scalar_prefetch=0,
            grid=(B, n_q, n_kv),
            in_specs=[
                pl.BlockSpec((1, tq, C), lambda b, qi, kv: (b, qi, 0)),   # q
                pl.BlockSpec((1, tk, C), kv_block),                       # k
                pl.BlockSpec((1, tk, C), kv_block),                       # v
                pl.BlockSpec((C, C), lambda b, qi, kv: (0, 0),
                             pipeline_mode=pl.Buffered(1)),               # Wproj
                pl.BlockSpec((1, C), lambda b, qi, kv: (0, 0)),           # bproj
            ],
            out_specs=pl.BlockSpec((1, tq, C), lambda b, qi, kv: (b, qi, 0)),
            scratch_shapes=[
                pltpu.VMEM((n_head, tq, 1), jnp.float32),    # m (running max)
                pltpu.VMEM((n_head, tq, 1), jnp.float32),    # l (running denom)
                pltpu.VMEM((n_head, tq, hd), jnp.float32),   # acc (unnormalized)
            ],
        ),
        compiler_params=pltpu.CompilerParams(
            # Only B and the q-tile axis are parallel (output is revisited
            # across the kv axis); B * n_q should be >= 2 for v7x megacore.
            dimension_semantics=("parallel", "parallel", "arbitrary"),
            vmem_limit_bytes=64 * 1024 * 1024),
        cost_estimate=pl.CostEstimate(
            flops=2 * B * n_head * T * T * hd + 2 * B * T * C * C,
            transcendentals=B * n_head * T * T // 2,
            bytes_accessed=3 * B * T * C * 2 + B * T * C * 4 + C * C * 2),
    )(q, k, v, wp, bp)


def _reference(x, params, n_head):
    """Plain-JAX f32 reference mirroring the PyTorch forward (dropout = identity)."""
    B, T, C = x.shape
    hd = C // n_head

    def linear(z, w, b):
        return z @ w + b

    q = linear(x, params["wq"], params["bq"]).reshape(B, T, n_head, hd).transpose(0, 2, 1, 3)
    k = linear(x, params["wk"], params["bk"]).reshape(B, T, n_head, hd).transpose(0, 2, 1, 3)
    v = linear(x, params["wv"], params["bv"]).reshape(B, T, n_head, hd).transpose(0, 2, 1, 3)

    att = jnp.einsum("bhtd,bhsd->bhts", q, k) * (1.0 / math.sqrt(hd))
    mask = jnp.tril(jnp.ones((T, T), dtype=bool))
    att = jnp.where(mask[None, None], att, -1e10)
    att = jax.nn.softmax(att, axis=-1)
    y = jnp.einsum("bhts,bhsd->bhtd", att, v)
    y = y.transpose(0, 2, 1, 3).reshape(B, T, C)
    return linear(y, params["wp"], params["bp"])


def _init_params(key, n_embd):
    """PyTorch-Linear-style init; weights stored (C_in, C_out) for x @ W."""
    bound = 1.0 / math.sqrt(n_embd)
    names = ["q", "k", "v", "p"]
    params = {}
    keys = jax.random.split(key, 2 * len(names))
    for i, n in enumerate(names):
        params[f"w{n}"] = jax.random.uniform(
            keys[2 * i], (n_embd, n_embd), jnp.float32, -bound, bound)
        params[f"b{n}"] = jax.random.uniform(
            keys[2 * i + 1], (1, n_embd), jnp.float32, -bound, bound)
    return params


if __name__ == "__main__":
    B, T, C, n_head = 2, 8, 32, 4   # block_size >= T, C % n_head == 0

    key = jax.random.PRNGKey(0)
    kx, kp = jax.random.split(key)
    x = jax.random.normal(kx, (B, T, C), dtype=jnp.float32)
    params = _init_params(kp, C)

    out = causal_self_attention(x, params, n_head)
    out = jax.block_until_ready(out)

    ref = _reference(x, params, n_head)
    assert out.shape == (B, T, C)
    # bf16 MXU inputs with f32 softmax/accumulation -> loosened tolerance.
    assert jnp.allclose(out, ref, atol=3e-2, rtol=3e-2), "mismatch vs reference"

    print("KERNEL_OK")
</pallas_src>

<mosaic_0001>
module attributes {stable_mosaic.version = 11 : i64} {
  func.func @_qkv_proj_kernel(%arg0: i32, %arg1: i32, %arg2: memref<1x8x32xf32, #tpu.memory_space<vmem>>, %arg3: memref<32x32xbf16, #tpu.memory_space<vmem>>, %arg4: memref<32x32xbf16, #tpu.memory_space<vmem>>, %arg5: memref<32x32xbf16, #tpu.memory_space<vmem>>, %arg6: memref<1x32xf32, #tpu.memory_space<vmem>>, %arg7: memref<1x32xf32, #tpu.memory_space<vmem>>, %arg8: memref<1x32xf32, #tpu.memory_space<vmem>>, %arg9: memref<1x8x32xbf16, #tpu.memory_space<vmem>>, %arg10: memref<1x8x32xbf16, #tpu.memory_space<vmem>>, %arg11: memref<1x8x32xbf16, #tpu.memory_space<vmem>>) attributes {dimension_semantics = [#tpu.dimension_semantics<parallel>, #tpu.dimension_semantics<parallel>], iteration_bounds = array<i64: 2, 1>, scalar_prefetch = 0 : i64, scratch_operands = 0 : i64, tpu.core_type = #tpu.core_type<tc>, window_params = [{transform_indices = @transform_0, window_bounds = array<i64: 1, 8, 32>}, {pipeline_mode = #tpu.pipeline_mode<synchronous>, transform_indices = @transform_1, window_bounds = array<i64: 32, 32>}, {pipeline_mode = #tpu.pipeline_mode<synchronous>, transform_indices = @transform_2, window_bounds = array<i64: 32, 32>}, {pipeline_mode = #tpu.pipeline_mode<synchronous>, transform_indices = @transform_3, window_bounds = array<i64: 32, 32>}, {pipeline_mode = #tpu.pipeline_mode<synchronous>, transform_indices = @transform_4, window_bounds = array<i64: 1, 32>}, {pipeline_mode = #tpu.pipeline_mode<synchronous>, transform_indices = @transform_5, window_bounds = array<i64: 1, 32>}, {pipeline_mode = #tpu.pipeline_mode<synchronous>, transform_indices = @transform_6, window_bounds = array<i64: 1, 32>}, {transform_indices = @transform_7, window_bounds = array<i64: 1, 8, 32>}, {transform_indices = @transform_8, window_bounds = array<i64: 1, 8, 32>}, {transform_indices = @transform_9, window_bounds = array<i64: 1, 8, 32>}]} {
    %c0 = arith.constant 0 : index
    %c0_0 = arith.constant 0 : index
    %c0_1 = arith.constant 0 : index
    %0 = vector.load %arg2[%c0, %c0_0, %c0_1] : memref<1x8x32xf32, #tpu.memory_space<vmem>>, vector<1x8x32xf32>
    %1 = vector.shape_cast %0 : vector<1x8x32xf32> to vector<8x32xf32>
    %2 = arith.truncf %1 : vector<8x32xf32> to vector<8x32xbf16>
    %c0_2 = arith.constant 0 : index
    %c0_3 = arith.constant 0 : index
    %3 = vector.load %arg3[%c0_2, %c0_3] : memref<32x32xbf16, #tpu.memory_space<vmem>>, vector<32x32xbf16>
    %cst = arith.constant dense<0.000000e+00> : vector<8x32xf32>
    %4 = tpu.matmul %2, %3, %cst {dimension_numbers = #tpu.dot_dimension_numbers<[1], [0], [0], [1], [0, 0, 1, 1], [], []>} : vector<8x32xbf16>, vector<32x32xbf16>, vector<8x32xf32> -> vector<8x32xf32>
    %c0_4 = arith.constant 0 : index
    %c0_5 = arith.constant 0 : index
    %5 = vector.load %arg6[%c0_4, %c0_5] : memref<1x32xf32, #tpu.memory_space<vmem>>, vector<1x32xf32>
    %6 = vector.broadcast %5 : vector<1x32xf32> to vector<8x32xf32>
    %7 = arith.addf %4, %6 : vector<8x32xf32>
    %c0_6 = arith.constant 0 : index
    %c0_7 = arith.constant 0 : index
    %8 = vector.load %arg4[%c0_6, %c0_7] : memref<32x32xbf16, #tpu.memory_space<vmem>>, vector<32x32xbf16>
    %cst_8 = arith.constant dense<0.000000e+00> : vector<8x32xf32>
    %9 = tpu.matmul %2, %8, %cst_8 {dimension_numbers = #tpu.dot_dimension_numbers<[1], [0], [0], [1], [0, 0, 1, 1], [], []>} : vector<8x32xbf16>, vector<32x32xbf16>, vector<8x32xf32> -> vector<8x32xf32>
    %c0_9 = arith.constant 0 : index
    %c0_10 = arith.constant 0 : index
    %10 = vector.load %arg7[%c0_9, %c0_10] : memref<1x32xf32, #tpu.memory_space<vmem>>, vector<1x32xf32>
    %11 = vector.broadcast %10 : vector<1x32xf32> to vector<8x32xf32>
    %12 = arith.addf %9, %11 : vector<8x32xf32>
    %c0_11 = arith.constant 0 : index
    %c0_12 = arith.constant 0 : index
    %13 = vector.load %arg5[%c0_11, %c0_12] : memref<32x32xbf16, #tpu.memory_space<vmem>>, vector<32x32xbf16>
    %cst_13 = arith.constant dense<0.000000e+00> : vector<8x32xf32>
    %14 = tpu.matmul %2, %13, %cst_13 {dimension_numbers = #tpu.dot_dimension_numbers<[1], [0], [0], [1], [0, 0, 1, 1], [], []>} : vector<8x32xbf16>, vector<32x32xbf16>, vector<8x32xf32> -> vector<8x32xf32>
    %c0_14 = arith.constant 0 : index
    %c0_15 = arith.constant 0 : index
    %15 = vector.load %arg8[%c0_14, %c0_15] : memref<1x32xf32, #tpu.memory_space<vmem>>, vector<1x32xf32>
    %16 = vector.broadcast %15 : vector<1x32xf32> to vector<8x32xf32>
    %17 = arith.addf %14, %16 : vector<8x32xf32>
    %18 = arith.truncf %7 : vector<8x32xf32> to vector<8x32xbf16>
    %c0_16 = arith.constant 0 : index
    %c0_17 = arith.constant 0 : index
    %c0_18 = arith.constant 0 : index
    %19 = vector.load %arg9[%c0_16, %c0_17, %c0_18] : memref<1x8x32xbf16, #tpu.memory_space<vmem>>, vector<1x8x32xbf16>
    %20 = vector.shape_cast %19 : vector<1x8x32xbf16> to vector<8x32xbf16>
    %21 = vector.shape_cast %18 : vector<8x32xbf16> to vector<1x8x32xbf16>
    tpu.vector_store %arg9[%c0_16, %c0_17, %c0_18], %21 {strides = array<i32>} : memref<1x8x32xbf16, #tpu.memory_space<vmem>>, vector<1x8x32xbf16>,
    %22 = arith.truncf %12 : vector<8x32xf32> to vector<8x32xbf16>
    %c0_19 = arith.constant 0 : index
    %c0_20 = arith.constant 0 : index
    %c0_21 = arith.constant 0 : index
    %23 = vector.load %arg10[%c0_19, %c0_20, %c0_21] : memref<1x8x32xbf16, #tpu.memory_space<vmem>>, vector<1x8x32xbf16>
    %24 = vector.shape_cast %23 : vector<1x8x32xbf16> to vector<8x32xbf16>
    %25 = vector.shape_cast %22 : vector<8x32xbf16> to vector<1x8x32xbf16>
    tpu.vector_store %arg10[%c0_19, %c0_20, %c0_21], %25 {strides = array<i32>} : memref<1x8x32xbf16, #tpu.memory_space<vmem>>, vector<1x8x32xbf16>,
    %26 = arith.truncf %17 : vector<8x32xf32> to vector<8x32xbf16>
    %c0_22 = arith.constant 0 : index
    %c0_23 = arith.constant 0 : index
    %c0_24 = arith.constant 0 : index
    %27 = vector.load %arg11[%c0_22, %c0_23, %c0_24] : memref<1x8x32xbf16, #tpu.memory_space<vmem>>, vector<1x8x32xbf16>
    %28 = vector.shape_cast %27 : vector<1x8x32xbf16> to vector<8x32xbf16>
    %29 = vector.shape_cast %26 : vector<8x32xbf16> to vector<1x8x32xbf16>
    tpu.vector_store %arg11[%c0_22, %c0_23, %c0_24], %29 {strides = array<i32>} : memref<1x8x32xbf16, #tpu.memory_space<vmem>>, vector<1x8x32xbf16>,
    return
  }
  func.func @transform_0(%arg0: i32, %arg1: i32) -> (i32, i32, i32) {
    %c0_i32 = arith.constant 0 : i32
    %c0_i32_0 = arith.constant 0 : i32
    return %arg0, %arg1, %c0_i32 : i32, i32, i32
  }
  func.func @transform_1(%arg0: i32, %arg1: i32) -> (i32, i32) {
    %c0_i32 = arith.constant 0 : i32
    %c0_i32_0 = arith.constant 0 : i32
    %c0_i32_1 = arith.constant 0 : i32
    return %c0_i32, %c0_i32_0 : i32, i32
  }
  func.func @transform_2(%arg0: i32, %arg1: i32) -> (i32, i32) {
    %c0_i32 = arith.constant 0 : i32
    %c0_i32_0 = arith.constant 0 : i32
    %c0_i32_1 = arith.constant 0 : i32
    return %c0_i32, %c0_i32_0 : i32, i32
  }
  func.func @transform_3(%arg0: i32, %arg1: i32) -> (i32, i32) {
    %c0_i32 = arith.constant 0 : i32
    %c0_i32_0 = arith.constant 0 : i32
    %c0_i32_1 = arith.constant 0 : i32
    return %c0_i32, %c0_i32_0 : i32, i32
  }
  func.func @transform_4(%arg0: i32, %arg1: i32) -> (i32, i32) {
    %c0_i32 = arith.constant 0 : i32
    %c0_i32_0 = arith.constant 0 : i32
    %c0_i32_1 = arith.constant 0 : i32
    return %c0_i32, %c0_i32_0 : i32, i32
  }
  func.func @transform_5(%arg0: i32, %arg1: i32) -> (i32, i32) {
    %c0_i32 = arith.constant 0 : i32
    %c0_i32_0 = arith.constant 0 : i32
    %c0_i32_1 = arith.constant 0 : i32
    return %c0_i32, %c0_i32_0 : i32, i32
  }
  func.func @transform_6(%arg0: i32, %arg1: i32) -> (i32, i32) {
    %c0_i32 = arith.constant 0 : i32
    %c0_i32_0 = arith.constant 0 : i32
    %c0_i32_1 = arith.constant 0 : i32
    return %c0_i32, %c0_i32_0 : i32, i32
  }
  func.func @transform_7(%arg0: i32, %arg1: i32) -> (i32, i32, i32) {
    %c0_i32 = arith.constant 0 : i32
    %c0_i32_0 = arith.constant 0 : i32
    return %arg0, %arg1, %c0_i32 : i32, i32, i32
  }
  func.func @transform_8(%arg0: i32, %arg1: i32) -> (i32, i32, i32) {
    %c0_i32 = arith.constant 0 : i32
    %c0_i32_0 = arith.constant 0 : i32
    return %arg0, %arg1, %c0_i32 : i32, i32, i32
  }
  func.func @transform_9(%arg0: i32, %arg1: i32) -> (i32, i32, i32) {
    %c0_i32 = arith.constant 0 : i32
    %c0_i32_0 = arith.constant 0 : i32
    return %arg0, %arg1, %c0_i32 : i32, i32, i32
  }
}

</mosaic_0001>

<bundles_post_ra>
// kernel: tpu_custom_call.1
= control target key start
LH: loop header
LB: loop body
LE: loop exit
PB: predicated region body
PF: predicated region fallthrough
CT: control target
= control target key end

     0   :  { %s1526_s0 = inlined_call_operand.hbm [shape: f32[2,8,32], index: 0, kind: input, shape index: {}]   ;;  %s1527_s1 = inlined_call_operand.hbm [shape: bf16[32,32], index: 1, kind: input, shape index: {}]   ;;  %s1528_s2 = inlined_call_operand.hbm [shape: bf16[32,32], index: 2, kind: input, shape index: {}]   ;;  %s1529_s3 = inlined_call_operand.hbm [shape: bf16[32,32], index: 3, kind: input, shape index: {}]   ;;  %s1530_s4 = inlined_call_operand.vmem [shape: f32[1,32], index: 4, kind: input, shape index: {}]   ;;  %s1531_s5 = inlined_call_operand.vmem [shape: f32[1,32], index: 5, kind: input, shape index: {}]   ;;  %s1532_s6 = inlined_call_operand.vmem [shape: f32[1,32], index: 6, kind: input, shape index: {}]   ;;  %s1533_s7 = inlined_call_operand.hbm [shape: bf16[2,8,32], index: 7, kind: output, shape index: {0}]   ;;  %s1534_s8 = inlined_call_operand.hbm [shape: bf16[2,8,32], index: 8, kind: output, shape index: {1}]   ;;  %s1535_s9 = inlined_call_operand.hbm [shape: bf16[2,8,32], index: 9, kind: output, shape index: {2}]  }
   0x1   :  { %1543 = sst [smem:[#allocation22_spill]] %s1526_s0 }
   0x2   :  { %1544 = sst [smem:[#allocation23_spill]] %s1527_s1 }
   0x3   :  { %1545 = sst [smem:[#allocation24_spill]] %s1528_s2 }
   0x4   :  { %1546 = sst [smem:[#allocation25_spill]] %s1529_s3 }
   0x5   :  { %1547 = sst [smem:[#allocation26_spill]] %s1530_s4 }
   0x6   :  { %15 = vsyncpa [#allocation3], 0 }
   0x7   :  { %17 = vsyncpa [#allocation3 + $0x1], 0 }
   0x8   :  { %18 = vsyncpa [#allocation6], 0 }
   0x9   :  { %19 = vsyncpa [#allocation9], 0 }
   0xa   :  { %20 = vsyncpa [#allocation4], 0 }
   0xb   :  { %22 = vsyncpa [#allocation4 + $0x1], 0 }
   0xc   :  { %23 = vsyncpa [#allocation12], 0 }
   0xd   :  { %25 = vsyncpa [#allocation12 + $0x1], 0  ;;  %s1276_s30 = smov 0   ;;  %s1278_s10 = smov 0  }
   0xe   :  { %s1280_s11 = smov 0   ;;  %s1282_s12 = smov 0  }
   0xf   :  { %s1284_s13 = smov 0   ;;  %s1286_s14 = smov 0  }
  0x10 LB: > { %s1307_s15 = sadd.s32 4294967295, %s1219_s14   ;;  %p785_p0 = scmp.ge.s32.totalorder %s1219_s14, 1  ;;  %s1219_s14 = sphi %s1286_s14, %s31_s14   ;;  %s1215_s13 = sphi %s1284_s13, %s1575_s13   ;;  %s1211_s12 = sphi %s1282_s12, %s1574_s12   ;;  %s1207_s11 = sphi %s1280_s11, %s1573_s11   ;;  %s1203_s10 = sphi %s1278_s10, %s1572_s10   ;;  %s1199_s30 = sphi %s1276_s30, %s1571_s30  }
  0x11   : > { %p66_p1 = scmp.eq.s32.totalorder %s1307_s15, 0  ;;  %p286_p2 = scmp.lt.s32.totalorder %s1219_s14, 3 }
  0x12   : > { %s1548_s1 = sld [smem:[#allocation23_spill]]  ;;  %s1221_s20 = smov [#allocation5]  }
  0x13   : > { %p1315_p3 = pnand %p785_p0, %p286_p2  ;;  %s299_s21 = sshll.u32 %s1221_s20, 4  ;;  %s300_s21 = int_to_ptr.vmem [resolvable:$true] %s299_s21 }
  0x14   : > { %p789_p6 = scmp.ge.s32.totalorder %s1219_s14, 2  ;;  %s1551_s2 = sld [smem:[#allocation24_spill]] }
  0x15   : > { %p861_p4 = pneg %p1315_p3  ;;  %s1222_s26 = smov 64  }
  0x16   : > { %s1223_s27 = smov 4   ;;  %s1224_s28 = smov [#allocation7]  }
  0x17   : > { %p1323_p5 = pnand %p861_p4, %p66_p1  ;;  %s313_s29 = sshll.u32 %s1224_s28, 4  ;;  %s314_s29 = int_to_ptr.vmem [resolvable:$true] %s313_s29 }
  0x18   : > { %s297_s18 = sshll.u32 %s1548_s1, 4  ;;  %s1552_s3 = sld [smem:[#allocation25_spill]]  ;;  %s298_s18 = int_to_ptr.hbm [resolvable:$true] %s297_s18 }
  0x19   : > { %864 = dma.hbm_to_vmem [thread:$0]  (!%p1323_p5), %s298_s18, 256, %s300_s21, [#allocation6], %s1222_s26, %s1222_s26, %s1223_s27  }
  0x1a   : > { %s311_s25 = sshll.u32 %s1551_s2, 4  ;;  %s1225_s23 = smov [#allocation8]   ;;  %s312_s25 = int_to_ptr.hbm [resolvable:$true] %s311_s25 }
  0x1b   : > { %867 = dma.hbm_to_vmem [thread:$0]  (!%p1323_p5), %s312_s25, 256, %s314_s29, [#allocation6], %s1222_s26, %s1222_s26, %s1223_s27  }
  0x1c   : > { %s327_s24 = sshll.u32 %s1225_s23, 4  ;;  %s1536_s18 = sadd.s32 4294967294, %s1219_s14   ;;  %s328_s24 = int_to_ptr.vmem [resolvable:$true] %s327_s24 }
  0x1d   : > { %s43_s21 = sadd.s32 1, %s1215_s13  ;;  %s52_s28 = sadd.s32 1, %s1207_s11 }
  0x1e   : > { %s325_s20 = sshll.u32 %s1552_s3, 4  ;;  %p45_p7 = scmp.ge.s32.totalorder %s43_s21, 2  ;;  %s326_s20 = int_to_ptr.hbm [resolvable:$true] %s325_s20 }
  0x1f   : > { %870 = dma.hbm_to_vmem [thread:$0]  (!%p1323_p5), %s326_s20, 256, %s328_s24, [#allocation9], %s1222_s26, %s1222_s26, %s1223_s27  }
  0x20   : > { %p59_p8 = scmp.ne.s32.totalorder %s1207_s11, %s1203_s10  ;;  %p60_p9 = scmp.eq.s32.totalorder %s1219_s14, 0 }
  0x21   : > { %p65_p10 = scmp.ne.s32.totalorder %s1203_s10, %s1199_s30  ;;  %s1577_s21 = smov (%p45_p7, %s43_s21), 0 }
  0x22   : > { %1553 = sst [smem:[#allocation19_spill]] %s1577_s21  ;;  %p1350_p11 = por %p60_p9, %p59_p8 }
  0x23   : > { %p1356_p12 = por %p66_p1, %p65_p10  ;;  %s47_s26 = ssub.s32 %s1215_s13, %s1577_s21 }
  0x24   : > { %p217_p13 = scmp.eq.s32.totalorder %s1307_s15, 1  ;;  %p50_p0 = scmp.eq.s32.totalorder %s47_s26, 0 }
  0x25   : > { %p223_p2 = scmp.eq.s32.totalorder %s1536_s18, 1  ;;  %p888_p5 = scmp.lt.s32.totalorder %s1219_s14, 2 }
  0x26   : > { %p1365_p4 = por %p217_p13, %p59_p8  ;;  %s350_s17 = sand.u32 1, %s1207_s11  }
  0x27   : > { %s1371_s29 = scalar_select %p50_p0, %s1207_s11, %s52_s28  }
  0x28   : > { %p1373_p7 = por %p223_p2, %p65_p10  ;;  %s790_s20 = sshll.u32 %s350_s17, 3 }
  0x29   : > { %s791_s23 = sshll.u32 %s1215_s13, 3  ;;  %s1558_s0 = sld [smem:[#allocation22_spill]] }
  0x2a   : > { %s354_s2 = scalar_lea.vmem [#allocation2], %s790_s20  ;;  %p872_p8 = pnand %p888_p5, %p1350_p11 }
  0x2b   : > { %s363_s18 = sshll.u32 %s354_s2, 4  ;;  %s351_s28 = scalar_lea.sflag [#allocation3], %s350_s17  ;;  %s364_s18 = int_to_ptr.vmem [resolvable:$true] %s363_s18 }
  0x2d   : > { %372 = sbr.rel (%p1315_p3) target bundleno = 233 (0xe9), region = 48 }
  0x2f   : > { %s359_s26 = scalar_lea.hbm %s1558_s0, %s791_s23 }
  0x30   : > { %s361_s3 = sshll.u32 %s359_s26, 4  ;;  %s362_s3 = int_to_ptr.hbm [resolvable:$true] %s361_s3 }
  0x31   : > { %874 = dma.hbm_to_vmem [thread:$0]  (!%p872_p8), %s362_s3, 128, %s364_s18, %s351_s28  }
  0x32   : > { %s1387_s21 = sand.u32 1, %s1203_s10  }
  0x33   : > { %s793_s1 = sshll.u32 %s1387_s21, 3  ;;  %s375_s23 = scalar_lea.sflag [#allocation3], %s1387_s21 }
  0x34   : > { %s378_s20 = scalar_lea.vmem [#allocation2], %s793_s1 }
  0x35   : > { %1178 = dma.done.wait (%p1356_p12), %s375_s23, 128  }
  0x36   : > { %1180 = vsyncadd (%p1356_p12), %s375_s23, 4294967168 }
  0x37   : > { %1182 = dma.done.wait (%p66_p1), [#allocation6], 512  }
  0x38   : > { %1184 = vsyncadd (%p66_p1), [#allocation6], 4294966784 }
  0x39   : > { %1186 = dma.done.wait (%p66_p1), [#allocation9], 256  }
  0x3a   : > { %1188 = vsyncadd (%p66_p1), [#allocation9], 4294967040  ;;  %v836_v0 = vld [vmem:[#allocation5 + $0x8] sm:$0xff]  ;;  %v838_v1 = vld [vmem:[#allocation7 + $0x8] sm:$0xff]  ;;  %vm462_vm0 = vcmask 261120   ;;  %s1404_s2 = sshll.u32 %s1387_s21, 2 }
  0x3b   : > { %v840_v2 = vld [vmem:[#allocation8 + $0x8] sm:$0xff]  ;;  %v835_v3 = vld [vmem:[#allocation5] sm:$0xff]  ;;  %472 = vmatpush.bf16.msra.mxu0 %v836_v0  ;;  %505 = vmatpush.bf16.msra.mxu1 %v838_v1  ;;  %v837_v4 = vld [vmem:[#allocation7] sm:$0xff]  ;;  %s830_s3 = sshll.u32 %s1211_s12, 2  ;;  %s557_s19 = sand.u32 1, %s1307_s15   ;;  %vm546_vm1 = vcmask 257024  }
  0x3c   : > { %v440_v5 = vld [vmem:[%s378_s20] sm:$0xff]  ;;  %538 = vmatpush.bf16.msra.mxu2 %v840_v2  ;;  %v839_v6 = vld [vmem:[#allocation8] sm:$0xff]  ;;  %s1559_s4 = sld [smem:[#allocation26_spill]]  ;;  %s589_s28 = scalar_lea.hbm %s1534_s8, %s830_s3 }
  0x3d   : > { %v441_v7 = vpack.c.bf16 %v440_v5, %v440_v5  ;;  %v947_v9 = vld [vmem:[%s1531_s5] ss:$0 sm:$0xff]  ;;  %s431_s1 = scalar_lea.vmem [#allocation11], %s1404_s2  ;;  %s574_s12 = scalar_lea.hbm %s1533_s7, %s830_s3 }
  0x3e   : > { %s1418_s23 = sshll.u32 %s431_s1, 4  ;;  %s1424_s15 = sshll.u32 %s589_s28, 4  ;;  %v948_v16 = vld [vmem:[%s1532_s6] ss:$0 sm:$0xff]  ;;  %s592_s23 = int_to_ptr.vmem [resolvable:$true] %s1418_s23  ;;  %s594_s15 = int_to_ptr.hbm [resolvable:$true] %s1424_s15 }
  0x3f   : > { %473 = vmatpush.bf16.msra.mxu0 %v835_v3  ;;  %506 = vmatpush.bf16.msra.mxu1 %v837_v4  ;;  %s1538_s18 = scalar_lea.vmem [#allocation10], %s1404_s2  ;;  %s1431_s22 = sshll.u32 %s574_s12, 4 }
  0x40   : > { %539 = vmatpush.bf16.msra.mxu2 %v839_v6  ;;  %s1429_s25 = sshll.u32 %s1538_s18, 4  ;;  %1561 = sst [smem:[#allocation21_spill]] %s1431_s22 }
  0x41   : > { %1560 = sst [smem:[#allocation20_spill]] %s1429_s25  ;;  %s604_s24 = scalar_lea.hbm %s1535_s9, %s830_s3 }
  0x42   : > { %808 = vmatmul.msk.bf16.vlgmr.msra.gmra.mxu0 %vm462_vm0, %v441_v7  ;;  %817 = vmatmul.msk.bf16.vlgmr.msra.gmra.mxu1 %vm462_vm0, %v441_v7  ;;  %v946_v8 = vld [vmem:[%s1559_s4] ss:$0 sm:$0xff]  ;;  %s1542_s20 = scalar_lea.vmem [#allocation13], %s1404_s2  ;;  %s1448_s18 = sshll.u32 %s604_s24, 4  ;;  %s609_s18 = int_to_ptr.hbm [resolvable:$true] %s1448_s18 }
  0x43   : > { %826 = vmatmul.msk.bf16.vlgmr.msra.gmra.mxu2 %vm462_vm0, %v441_v7  ;;  %s1446_s12 = sshll.u32 %s1542_s20, 4  ;;  %s1450_s0 = scalar_lea.sflag [#allocation12], %s557_s19  ;;  %s607_s12 = int_to_ptr.vmem [resolvable:$true] %s1446_s12 }
  0x44   : > { %s1083_s3 = sshra.s32 %s594_s15, 4  ;;  %s1089_s25 = scalar_lea.hbm %s1534_s8, 8  ;;  %s1084_s3 = int_to_ptr.hbm [resolvable:$true] %s1083_s3 }
  0x45   : > { %s1085_s17 = scalar_lea.hbm %s1084_s3, 4  ;;  %p1090_p10 = scmp.lt.s32.totalorder %s1084_s3, %s1534_s8 }
  0x46   : > { %p1086_p1 = scmp.ne.s32.totalorder %s1084_s3, %s1085_s17  ;;  %p1091_p11 = scmp.lt.s32.totalorder %s1089_s25, %s1085_s17 }
  0x48   : > { %p1087_p3 = pnand %p1086_p1, %p1365_p4  ;;  %p1092_p12 = por %p1091_p11, %p1090_p10 }
  0x4a   : > { %p1088_p9 = pneg %p1087_p3 }
  0x4c   : > { %p1093_p13 = pnand %p1092_p12, %p1088_p9 }
  0xbf   : > { %v475_v10 = vpop.f32.mrf.mxu0  ;;  %v508_v11 = vpop.f32.mrf.mxu1 }
  0xc0   : > { %v476_v12 = vadd.f32 %v946_v8, %v475_v10  ;;  %v509_v13 = vadd.f32 %v947_v9, %v508_v11 }
  0xc2   : > { %v545_v14 = vpack.c.bf16 %v476_v12, %v476_v12  ;;  %v548_v15 = vpack.c.bf16 %v509_v13, %v509_v13 }
  0xc4   : > { %549 = vst.msk [vmem:[%s431_s1] sm:$0xf] %vm546_vm1, %v548_v15 }
  0xc5   : > { %1096 = shalt.err (!%p1093_p13)
}
  0xc6   : > { %s1562_s19 = sld [smem:[#allocation21_spill]]  ;;  %s1563_s24 = scalar_lea.vmem [#allocation10], %s1404_s2  ;;  %v541_v17 = vpop.f32.mrf.mxu2 }
  0xc7   : > { %856 = dma.vmem_to_hbm [thread:$0]  (%p1365_p4), %s592_s23, 64, %s594_s15, %s1450_s0   ;;  %547 = vst.msk [vmem:[%s1563_s24] sm:$0xf] %vm546_vm1, %v545_v14 }
  0xc8   : > { %s553_s22 = scalar_lea.sflag [#allocation4], %s1387_s21  ;;  %s1117_s1 = scalar_lea.hbm %s1533_s7, 8 }
  0xcc   : > { %s1564_s3 = int_to_ptr.hbm [resolvable:$true] %s1562_s19 }
  0xcd   : > { %s1111_s25 = sshra.s32 %s1564_s3, 4  ;;  %s1112_s25 = int_to_ptr.hbm [resolvable:$true] %s1111_s25 }
  0xce   : > { %s1113_s17 = scalar_lea.hbm %s1112_s25, 4  ;;  %p1118_p8 = scmp.lt.s32.totalorder %s1112_s25, %s1533_s7 }
  0xcf   : > { %p1114_p0 = scmp.ne.s32.totalorder %s1112_s25, %s1113_s17  ;;  %p1119_p1 = scmp.lt.s32.totalorder %s1117_s1, %s1113_s17 }
  0xd1   : > { %p1115_p2 = pnand %p1114_p0, %p1365_p4  ;;  %p1120_p3 = por %p1119_p1, %p1118_p8 }
  0xd3   : > { %p1116_p5 = pneg %p1115_p2 }
  0xd5   : > { %p1121_p9 = pnand %p1120_p3, %p1116_p5 }
  0xd7   : > { %1124 = shalt.err (!%p1121_p9)
}
  0xd8   : > { %s1565_s21 = smov %s1564_s3  ;;  %s1566_s23 = sld [smem:[#allocation20_spill]]  ;;  %v542_v18 = vadd.f32 %v948_v16, %v541_v17  ;;  %v477_v19 = vpop.f32.mrf.mxu0  ;;  %v510_v20 = vpop.f32.mrf.mxu1 }
  0xd9   : > { %s1568_s4 = scalar_lea.vmem [#allocation13], %s1404_s2  ;;  %s1139_s20 = sshra.s32 %s609_s18, 4  ;;  %s1140_s20 = int_to_ptr.hbm [resolvable:$true] %s1139_s20 }
  0xda   : > { %v550_v21 = vpack.c.bf16 %v542_v18, %v542_v18  ;;  %s1141_s24 = scalar_lea.hbm %s1140_s20, 4  ;;  %p1146_p13 = scmp.lt.s32.totalorder %s1140_s20, %s1535_s9 }
  0xdb   : > { %p1142_p10 = scmp.ne.s32.totalorder %s1140_s20, %s1141_s24 }
  0xdc   : > { %551 = vst.msk [vmem:[%s1568_s4] sm:$0xf] %vm546_vm1, %v550_v21 }
  0xdd   : > { %p1143_p11 = pnand %p1142_p10, %p1365_p4 }
  0xde   : > { %s1567_s15 = int_to_ptr.vmem [resolvable:$true] %s1566_s23 }
  0xdf   : > { %855 = dma.vmem_to_hbm [thread:$0]  (%p1365_p4), %s1567_s15, 64, %s1565_s21, %s553_s22  }
  0xe0   : > { %p1144_p12 = pneg %p1143_p11  ;;  %s1145_s22 = scalar_lea.hbm %s1535_s9, 8 }
  0xe1   : > { %p1147_p0 = scmp.lt.s32.totalorder %s1145_s22, %s1141_s24 }
  0xe3   : > { %p1148_p2 = por %p1147_p0, %p1146_p13 }
  0xe5   : > { %p1149_p5 = pnand %p1148_p2, %p1144_p12 }
  0xe7   : > { %1152 = shalt.err (!%p1149_p5)
}
  0xe8   : > { %857 = dma.vmem_to_hbm [thread:$0]  (%p1365_p4), %s607_s12, 64, %s609_s18, %s1450_s0   ;;  %v543_v22 = vpop.f32.mrf.mxu2 }
  0xe9 PF: > { %s620_s2 = sand.u32 1, %s1199_s30   ;;  %p876_p8 = pnand %p789_p6, %p1373_p7 }
  0xea   : > { %s621_s26 = scalar_lea.sflag [#allocation4], %s620_s2 }
  0xeb   : > { %p877_p1 = pneg %p876_p8 }
  0xed   : > { %1190 = dma.done.wait (%p877_p1), %s621_s26, 64  }
  0xee   : > { %1192 = vsyncadd (%p877_p1), %s621_s26, 4294967232  ;;  %s1569_s28 = sadd.s32 4294967294, %s1219_s14  }
  0xef   : > { %s630_s1 = sand.u32 1, %s1569_s28  }
  0xf0   : > { %s631_s21 = scalar_lea.sflag [#allocation12], %s630_s1 }
  0xf1   : > { %1194 = dma.done.wait (%p877_p1), %s631_s21, 128  }
  0xf2   : > { %1196 = vsyncadd (%p877_p1), %s631_s21, 4294967168  ;;  %s31_s14 = sadd.s32 1, %s1219_s14   ;;  %s1570_s27 = sld [smem:[#allocation19_spill]] }
  0xf3   : > { %p28_p4 = scmp.ge.s32.totalorder %s31_s14, 4   ;;  %s1571_s30 = smov %s1203_s10 }
  0xf4   : > { %s1572_s10 = smov %s1207_s11  ;;  %s1573_s11 = smov %s1371_s29 }
  0xf5   : > { %s1574_s12 = smov %s1215_s13  ;;  %30 = sbr.rel (!%p28_p4) target bundleno = 16 (0x10), region = 137 }
  0xf8   : > { %s1575_s13 = smov %s1570_s27 }
  0xfa   :  { %647 = vsyncpa [#allocation3], 1 }
  0xfb   :  { %649 = vsyncpa [#allocation3 + $0x1], 1 }
  0xfc   :  { %650 = vsyncpa [#allocation6], 1 }
  0xfd   :  { %651 = vsyncpa [#allocation9], 1 }
  0xfe   :  { %652 = vsyncpa [#allocation4], 1 }
  0xff   :  { %654 = vsyncpa [#allocation4 + $0x1], 1 }
 0x100   :  { %655 = vsyncpa [#allocation12], 1 }
 0x101   :  { %657 = vsyncpa [#allocation12 + $0x1], 1 }

</bundles_post_ra>
